<compile_context>
chip_gen: v5e
topology: v5e:2x2
jax: 0.10.0
libtpu: 0.0.40
codegen_flags: <defaults>
</compile_context>

<pallas_src>
import jax
import jax.numpy as jnp
from jax.experimental import pallas as pl
from jax.experimental.pallas import tpu as pltpu


def _round_up(x: int, m: int) -> int:
    return ((x + m - 1) // m) * m


def _cdiv(a: int, b: int) -> int:
    return (a + b - 1) // b


def two_layer_kernel(x_ref, w1_ref, b1_ref, w2_ref, b2_ref, o_ref):
    # x_ref:  [TN, D_in]  (bf16)    w1_ref: [D_in, H_p]  (bf16)   b1_ref: [1, H_p]  (f32)
    # w2_ref: [H_p, D_out](bf16)    b2_ref: [1, D_out]   (f32)    o_ref:  [TN, D_out]
    x = x_ref[...]
    # linear1 (bf16 MXU feed, f32 accumulation) + bias/ReLU epilogue in f32
    h = jnp.dot(x, w1_ref[...], preferred_element_type=jnp.float32)
    h = jnp.maximum(h + b1_ref[...], 0.0)
    # linear2: feed the MXU bf16 again, accumulate f32
    h = h.astype(w2_ref.dtype)
    y = jnp.dot(h, w2_ref[...], preferred_element_type=jnp.float32)
    o_ref[...] = (y + b2_ref[...]).astype(o_ref.dtype)


def two_layer_net(x, w1, b1, w2, b2, *, max_tile=512, vmem_budget=48 * 1024 * 1024):
    """x: [N, D_in]; w1: [H, D_in]; b1: [H]; w2: [D_out, H]; b2: [D_out]."""
    N, D_in = x.shape
    H = w1.shape[0]
    D_out = w2.shape[0]

    # Lane-pad only the hidden dim (exact: padded b1/W1 columns and W2 rows are 0).
    # TODO(synk): on v6e/v7x a 256-multiple keeps the 2x256x256 MXU fully fed.
    H_p = _round_up(H, 128)

    # bf16 MXU operands, f32 biases for the exact epilogue.
    mxu_dtype = jnp.bfloat16
    x_in = x.astype(mxu_dtype)                                            # [N, D_in]
    w1t = jnp.pad(w1.T, ((0, 0), (0, H_p - H))).astype(mxu_dtype)         # [D_in, H_p]
    w2t = jnp.pad(w2.T, ((0, H_p - H), (0, 0))).astype(mxu_dtype)         # [H_p, D_out]
    b1_2d = jnp.pad(b1, (0, H_p - H)).reshape(1, H_p).astype(jnp.float32)
    b2_2d = b2.reshape(1, D_out).astype(jnp.float32)

    # Batch tiling: at least 2 grid steps when there is enough work (v7x megacore),
    # otherwise a single tile; batch is never rounded up to a multiple of TN —
    # the boundary block's extra rows are masked on writeback.
    min_steps = 2 if N >= 16 else 1
    steps = max(_cdiv(N, max_tile), min_steps)
    TN = _round_up(_cdiv(N, steps), 8)

    def vmem_bytes(tn):
        w_bytes = (D_in * H_p + H_p * D_out) * 2          # single-buffered bf16 weights
        b_bytes = (H_p + D_out) * 4                       # f32 biases
        x_tiles = 2 * tn * D_in * 2                       # double-buffered bf16 x tile
        o_tiles = 2 * tn * D_out * x.dtype.itemsize       # double-buffered out tile
        h_scratch = tn * H_p * 4                          # f32 intermediate
        return w_bytes + b_bytes + x_tiles + o_tiles + h_scratch

    # Shrink the batch tile until the estimate fits the smallest-VMEM chip (v7x).
    while TN > 8 and vmem_bytes(TN) > int(0.9 * vmem_budget):
        TN = _round_up(TN // 2, 8)
    # TODO(synk): if the resident weights alone exceed the budget, add a second
    # grid axis over H / D_out with an accumulator instead of shrinking TN.

    grid = (_cdiv(N, TN),)
    resident = dict(pipeline_mode=pl.Buffered(1))  # constant index_map -> one buffer

    flops = 2 * N * (D_in * H + H * D_out)
    bytes_accessed = (
        N * D_in * 2                      # x (bf16)
        + (D_in * H_p + H_p * D_out) * 2  # weights (bf16)
        + (H_p + D_out) * 4               # biases (f32)
        + N * D_out * x.dtype.itemsize    # output
    )

    out = pl.pallas_call(
        two_layer_kernel,
        out_shape=jax.ShapeDtypeStruct((N, D_out), x.dtype),
        grid_spec=pltpu.PrefetchScalarGridSpec(
            num_scalar_prefetch=0,
            grid=grid,
            in_specs=[
                # x streams through, one batch tile per grid step (lane dim = full D_in).
                pl.BlockSpec((TN, D_in), lambda i: (i, 0)),
                # Weights / biases resident in VMEM across all steps (single-buffered).
                pl.BlockSpec((D_in, H_p), lambda i: (0, 0), **resident),
                pl.BlockSpec((1, H_p), lambda i: (0, 0), **resident),
                pl.BlockSpec((H_p, D_out), lambda i: (0, 0), **resident),
                pl.BlockSpec((1, D_out), lambda i: (0, 0), **resident),
            ],
            out_specs=pl.BlockSpec((TN, D_out), lambda i: (i, 0)),
        ),
        compiler_params=pltpu.CompilerParams(
            dimension_semantics=("parallel",),
            vmem_limit_bytes=vmem_budget,
        ),
        cost_estimate=pl.CostEstimate(
            flops=flops, transcendentals=0, bytes_accessed=bytes_accessed),
    )(x_in, w1t, b1_2d, w2t, b2_2d)

    return out


if __name__ == "__main__":
    # Small shapes implied by the module: TwoLayerNet(D_in, H, D_out)
    N, D_in, H, D_out = 8, 32, 64, 16

    key = jax.random.PRNGKey(0)
    k_x, k_w1, k_b1, k_w2, k_b2 = jax.random.split(key, 5)

    x = jax.random.normal(k_x, (N, D_in), dtype=jnp.float32)

    # PyTorch-style Linear init: uniform(-1/sqrt(fan_in), 1/sqrt(fan_in))
    bound1 = 1.0 / (D_in ** 0.5)
    w1 = jax.random.uniform(k_w1, (H, D_in), jnp.float32, -bound1, bound1)
    b1 = jax.random.uniform(k_b1, (H,), jnp.float32, -bound1, bound1)
    bound2 = 1.0 / (H ** 0.5)
    w2 = jax.random.uniform(k_w2, (D_out, H), jnp.float32, -bound2, bound2)
    b2 = jax.random.uniform(k_b2, (D_out,), jnp.float32, -bound2, bound2)

    y = two_layer_net(x, w1, b1, w2, b2)
    y = jax.block_until_ready(y)

    # Reference check in plain JAX (f32); looser tolerance for the bf16 MXU path.
    h_ref = jnp.maximum(x @ w1.T + b1, 0.0)
    y_ref = h_ref @ w2.T + b2
    assert y.shape == (N, D_out)
    assert jnp.allclose(y, y_ref, atol=5e-2, rtol=5e-2)

    print("KERNEL_OK")
</pallas_src>

<mosaic_0001>
module attributes {stable_mosaic.version = 11 : i64} {
  func.func @two_layer_kernel(%arg0: i32, %arg1: memref<8x32xbf16, #tpu.memory_space<vmem>>, %arg2: memref<32x128xbf16, #tpu.memory_space<vmem>>, %arg3: memref<1x128xf32, #tpu.memory_space<vmem>>, %arg4: memref<128x16xbf16, #tpu.memory_space<vmem>>, %arg5: memref<1x16xf32, #tpu.memory_space<vmem>>, %arg6: memref<8x16xf32, #tpu.memory_space<vmem>>) attributes {dimension_semantics = [#tpu.dimension_semantics<parallel>], iteration_bounds = array<i64: 1>, scalar_prefetch = 0 : i64, scratch_operands = 0 : i64, tpu.core_type = #tpu.core_type<tc>, window_params = [{transform_indices = @transform_0, window_bounds = array<i64: 8, 32>}, {pipeline_mode = #tpu.pipeline_mode<synchronous>, transform_indices = @transform_1, window_bounds = array<i64: 32, 128>}, {pipeline_mode = #tpu.pipeline_mode<synchronous>, transform_indices = @transform_2, window_bounds = array<i64: 1, 128>}, {pipeline_mode = #tpu.pipeline_mode<synchronous>, transform_indices = @transform_3, window_bounds = array<i64: 128, 16>}, {pipeline_mode = #tpu.pipeline_mode<synchronous>, transform_indices = @transform_4, window_bounds = array<i64: 1, 16>}, {transform_indices = @transform_5, window_bounds = array<i64: 8, 16>}]} {
    %c0 = arith.constant 0 : index
    %c0_0 = arith.constant 0 : index
    %0 = vector.load %arg1[%c0, %c0_0] : memref<8x32xbf16, #tpu.memory_space<vmem>>, vector<8x32xbf16>
    %c0_1 = arith.constant 0 : index
    %c0_2 = arith.constant 0 : index
    %1 = vector.load %arg2[%c0_1, %c0_2] : memref<32x128xbf16, #tpu.memory_space<vmem>>, vector<32x128xbf16>
    %cst = arith.constant dense<0.000000e+00> : vector<8x128xf32>
    %2 = tpu.matmul %0, %1, %cst {dimension_numbers = #tpu.dot_dimension_numbers<[1], [0], [0], [1], [0, 0, 1, 1], [], []>} : vector<8x32xbf16>, vector<32x128xbf16>, vector<8x128xf32> -> vector<8x128xf32>
    %c0_3 = arith.constant 0 : index
    %c0_4 = arith.constant 0 : index
    %3 = vector.load %arg3[%c0_3, %c0_4] : memref<1x128xf32, #tpu.memory_space<vmem>>, vector<1x128xf32>
    %4 = vector.broadcast %3 : vector<1x128xf32> to vector<8x128xf32>
    %5 = arith.addf %2, %4 : vector<8x128xf32>
    %cst_5 = arith.constant 0.000000e+00 : f32
    %6 = vector.broadcast %cst_5 : f32 to vector<8x128xf32>
    %7 = arith.maximumf %5, %6 : vector<8x128xf32>
    %8 = arith.truncf %7 : vector<8x128xf32> to vector<8x128xbf16>
    %c0_6 = arith.constant 0 : index
    %c0_7 = arith.constant 0 : index
    %9 = vector.load %arg4[%c0_6, %c0_7] : memref<128x16xbf16, #tpu.memory_space<vmem>>, vector<128x16xbf16>
    %cst_8 = arith.constant dense<0.000000e+00> : vector<8x16xf32>
    %10 = tpu.matmul %8, %9, %cst_8 {dimension_numbers = #tpu.dot_dimension_numbers<[1], [0], [0], [1], [0, 0, 1, 1], [], []>} : vector<8x128xbf16>, vector<128x16xbf16>, vector<8x16xf32> -> vector<8x16xf32>
    %c0_9 = arith.constant 0 : index
    %c0_10 = arith.constant 0 : index
    %11 = vector.load %arg5[%c0_9, %c0_10] : memref<1x16xf32, #tpu.memory_space<vmem>>, vector<1x16xf32>
    %12 = vector.broadcast %11 : vector<1x16xf32> to vector<8x16xf32>
    %13 = arith.addf %10, %12 : vector<8x16xf32>
    %c0_11 = arith.constant 0 : index
    %c0_12 = arith.constant 0 : index
    %14 = vector.load %arg6[%c0_11, %c0_12] : memref<8x16xf32, #tpu.memory_space<vmem>>, vector<8x16xf32>
    tpu.vector_store %arg6[%c0_11, %c0_12], %13 {strides = array<i32>} : memref<8x16xf32, #tpu.memory_space<vmem>>, vector<8x16xf32>,
    return
  }
  func.func @transform_0(%arg0: i32) -> (i32, i32) {
    %c0_i32 = arith.constant 0 : i32
    %c0_i32_0 = arith.constant 0 : i32
    return %arg0, %c0_i32 : i32, i32
  }
  func.func @transform_1(%arg0: i32) -> (i32, i32) {
    %c0_i32 = arith.constant 0 : i32
    %c0_i32_0 = arith.constant 0 : i32
    %c0_i32_1 = arith.constant 0 : i32
    return %c0_i32, %c0_i32_0 : i32, i32
  }
  func.func @transform_2(%arg0: i32) -> (i32, i32) {
    %c0_i32 = arith.constant 0 : i32
    %c0_i32_0 = arith.constant 0 : i32
    %c0_i32_1 = arith.constant 0 : i32
    return %c0_i32, %c0_i32_0 : i32, i32
  }
  func.func @transform_3(%arg0: i32) -> (i32, i32) {
    %c0_i32 = arith.constant 0 : i32
    %c0_i32_0 = arith.constant 0 : i32
    %c0_i32_1 = arith.constant 0 : i32
    return %c0_i32, %c0_i32_0 : i32, i32
  }
  func.func @transform_4(%arg0: i32) -> (i32, i32) {
    %c0_i32 = arith.constant 0 : i32
    %c0_i32_0 = arith.constant 0 : i32
    %c0_i32_1 = arith.constant 0 : i32
    return %c0_i32, %c0_i32_0 : i32, i32
  }
  func.func @transform_5(%arg0: i32) -> (i32, i32) {
    %c0_i32 = arith.constant 0 : i32
    %c0_i32_0 = arith.constant 0 : i32
    return %arg0, %c0_i32 : i32, i32
  }
}

</mosaic_0001>

<bundles_post_ra>
// kernel: tpu_custom_call.1
= control target key start
LH: loop header
LB: loop body
LE: loop exit
PB: predicated region body
PF: predicated region fallthrough
CT: control target
= control target key end

     0   :  { %s314_s0 = inlined_call_operand.vmem [shape: bf16[8,32], index: 0, kind: input, shape index: {}]   ;;  %s315_s1 = inlined_call_operand.vmem [shape: bf16[32,128], index: 1, kind: input, shape index: {}]   ;;  %s316_s2 = inlined_call_operand.vmem [shape: f32[1,128], index: 2, kind: input, shape index: {}]   ;;  %s317_s3 = inlined_call_operand.vmem [shape: bf16[128,16], index: 3, kind: input, shape index: {}]   ;;  %s318_s4 = inlined_call_operand.vmem [shape: f32[1,16], index: 4, kind: input, shape index: {}]   ;;  %s319_s5 = inlined_call_operand.hbm [shape: f32[8,16], index: 5, kind: output, shape index: {}]  }
   0x1   :  { %v203_v0 = vld [vmem:[%s315_s1 + $0x8] sm:$0xff]  ;;  %v211_v1 = vld [vmem:[%s317_s3 + $0x38] sm:$0xff]  ;;  %v202_v2 = vld [vmem:[%s315_s1] sm:$0xff] }
   0x2   :  { %53 = vmatpush.bf16.msra.mxu0 %v203_v0  ;;  %130 = vmatpush.bf16.msra.mxu1 %v211_v1  ;;  %v210_v3 = vld [vmem:[%s317_s3 + $0x30] sm:$0xff] }
   0x3   :  { %10 = vsyncpa [#allocation3], 0  ;;  %v22_v4 = vld [vmem:[%s314_s0] sm:$0xf]  ;;  %vm43_vm0 = vcmask 261120   ;;  %v209_v5 = vld [vmem:[%s317_s3 + $0x28] sm:$0xff] }
   0x4   :  { %v208_v6 = vld [vmem:[%s317_s3 + $0x20] sm:$0xff]  ;;  %v207_v7 = vld [vmem:[%s317_s3 + $0x18] sm:$0xff]  ;;  %v206_v8 = vld [vmem:[%s317_s3 + $0x10] sm:$0xff]  ;;  %s241_s17 = smov [#allocation2]   ;;  %vm143_vm1 = vcmask 130048  }
   0x5   :  { %v205_v9 = vld [vmem:[%s317_s3 + $0x8] sm:$0xff]  ;;  %v204_v10 = vld [vmem:[%s317_s3] sm:$0xff]  ;;  %s150_s18 = sshll.u32 %s241_s17, 4  ;;  %s152_s3 = sshll.u32 %s319_s5, 4  ;;  %s151_s18 = int_to_ptr.vmem [resolvable:$true] %s150_s18  ;;  %s153_s3 = int_to_ptr.hbm [resolvable:$true] %s152_s3 }
   0x6   :  { %54 = vmatpush.bf16.msra.mxu0 %v202_v2  ;;  %131 = vmatpush.bf16.msra.mxu1 %v210_v3  ;;  %v213_v11 = vld [vmem:[%s316_s2] ss:$0 sm:$0xff] }
   0x7   :  { %v214_v17 = vld [vmem:[%s318_s4] ss:$0 sm:$0xff] }
   0x9   :  { %169 = vmatmul.msk.bf16.vlgmr.msra.gmra.mxu0 %vm43_vm0, %v22_v4 }
   0xa   :  { %132 = vmatpush.bf16.msra.mxu1 %v209_v5 }
   0xe   :  { %133 = vmatpush.bf16.msra.mxu1 %v208_v6 }
  0x12   :  { %134 = vmatpush.bf16.msra.mxu1 %v207_v7 }
  0x16   :  { %135 = vmatpush.bf16.msra.mxu1 %v206_v8 }
  0x1a   :  { %136 = vmatpush.bf16.msra.mxu1 %v205_v9 }
  0x1e   :  { %137 = vmatpush.bf16.msra.mxu1 %v204_v10 }
  0x86   :  { %v56_v12 = vpop.f32.mrf.mxu0 }
  0x87   :  { %v57_v13 = vadd.f32 %v213_v11, %v56_v12 }
  0x89   :  { %v60_v14 = vmax.f32 %v57_v13, 0.0 }
  0x8b   :  { %v61_v15 = vpack.c.bf16 %v60_v14, %v60_v14 }
  0x8d   :  { %138 = vmatmul.bf16.vlgmr.msra.gmra.mxu1 %v61_v15 }
  0x8e   :  { %v58_v16 = vpop.f32.mrf.mxu0 }
 0x10a   :  { %v139_v18 = vpop.f32.mrf.mxu1 }
 0x10b   :  { %v140_v19 = vadd.f32 %v214_v17, %v139_v18 }
 0x10d   :  { %144 = vst.msk [vmem:[#allocation2] sm:$0xff] %vm143_vm1, %v140_v19 }
 0x10e   :  { %155 = dma.vmem_to_hbm [thread:$0]  %s151_s18, 128, %s153_s3, [#allocation3]  }
 0x112   :  { %v141_v20 = vpop.f32.mrf.mxu1 }
 0x113   :  { %239 = dma.done.wait [#allocation3], 128  }
 0x114   :  { %240 = vsyncadd [#allocation3], 4294967168 }
 0x115   :  { %160 = vsyncpa [#allocation3], 1 }

</bundles_post_ra>
